<compile_context>
chip_gen: v7x
topology: tpu7x:2x2x1
jax: 0.10.0
libtpu: 0.0.40
codegen_flags: <defaults>
</compile_context>

<pallas_src>
import jax
import jax.numpy as jnp
from jax.experimental import pallas as pl
from jax.experimental.pallas import tpu as pltpu


def _round_up(n, m):
    return ((n + m - 1) // m) * m


def _vmem_capacity_bytes():
    try:
        return int(pltpu.get_tpu_info().vmem_capacity_bytes)
    except Exception:
        return 64 * 1024 * 1024  # conservative fallback: v7x per-TensorCore VMEM


def _choose_block_rows(B, F, x_bytes, out_bytes, fixed_bytes, row_extra_bytes, budget):
    """Batch-tile rows: ~4 MiB x blocks, 128-row aligned, fit the VMEM budget,
    and give >= 2 grid steps (v7x megacore) whenever the batch allows it."""
    if B <= 128:
        return B  # one block covering the whole (small) batch; block dim == array dim
    per_row = 2 * F * x_bytes + row_extra_bytes + 2 * out_bytes   # double-buffered tiles
    tb_target = max(1, (4 << 20) // max(1, F * x_bytes))          # ~4 MiB x tile
    tb_fit = max(1, (budget - fixed_bytes) // max(1, per_row))
    tb = min(tb_target, tb_fit, _round_up(B, 128))
    tb = max(128, (tb // 128) * 128)
    # At least two grid steps so dimension_semantics=("parallel",) can split the
    # batch across v7x's two TensorCores.
    tb = min(tb, max(128, _round_up(pl.cdiv(B, 2), 128)))
    return tb


def _disc_proj_kernel(x_ref, y_ref, e_ref, b_ref, o_ref):
    # x_ref : [TB, F]   input tile (streamed per grid step)
    # y_ref : [TB, 1]   int32 labels tile (streamed per grid step)
    # e_ref : [C, F]    embedding + linear weight row (VMEM-resident, constant index_map)
    # b_ref : [1]       bias (SMEM scalar)
    # o_ref : [1, 1, TB] lane-dense output tile
    tb = y_ref.shape[0]
    c = e_ref.shape[0]
    # Build the one-hot in-kernel (cheap VPU filler under the exposed x DMA);
    # garbage labels of out-of-range rows only produce garbage in discarded rows.
    cls = jax.lax.broadcasted_iota(jnp.int32, (tb, c), 1)
    h = (y_ref[...] == cls).astype(e_ref.dtype)                           # [TB, C]
    # Per-row weight = embedding[y] + linear weight (fold done in the wrapper).
    w_row = jnp.dot(h, e_ref[...], preferred_element_type=jnp.float32)    # [TB, F] f32
    prod = x_ref[...].astype(jnp.float32) * w_row                         # f32 accumulate
    d = jnp.sum(prod, axis=1, keepdims=True) + b_ref[0]                   # [TB, 1] f32
    o_ref[...] = jnp.transpose(d)[None, :, :].astype(o_ref.dtype)


def _disc_linear_kernel(x_ref, w_ref, b_ref, o_ref):
    # Unconditional (y is None) path: linear head only.
    # Multiply stays in the input dtype (bf16-native VPU on v6e/v7x); the
    # F-reduction accumulates in f32.
    prod = x_ref[...] * w_ref[...]                                        # [TB, F]
    d = jnp.sum(prod, axis=1, keepdims=True, dtype=jnp.float32) + b_ref[0]
    o_ref[...] = jnp.transpose(d)[None, :, :].astype(o_ref.dtype)


def linear_discriminator_pallas(inputs, weight, bias, embedding=None, y=None):
    """inputs: [B, F]; weight: [1, F]; bias: [1]; embedding: [C, F]; y: [B] ints."""
    B, F = inputs.shape
    out_dtype = inputs.dtype
    x_bytes = inputs.dtype.itemsize
    out_bytes = jnp.dtype(out_dtype).itemsize

    conditional = (y is not None) and (embedding is not None)

    vmem_cap = _vmem_capacity_bytes()
    budget = int(0.75 * vmem_cap)       # per-generation usable VMEM budget

    w_row = weight.reshape(1, F)
    b_smem = bias.reshape(1).astype(jnp.float32)

    if conditional:
        C = embedding.shape[0]
        # Fold the linear weight into the embedding table: one input stream and
        # one VPU add per element removed from the kernel.
        e2 = embedding + w_row                                   # [C, F]
        e_bytes = jnp.dtype(e2.dtype).itemsize
        fixed = 2 * C * F * e_bytes                              # table (2 pipeline buffers)
        row_extra = 2 * 1 * 4                                    # [TB,1] int32 labels, 2 buffers
    else:
        fixed = 2 * F * jnp.dtype(w_row.dtype).itemsize
        row_extra = 0

    TB = _choose_block_rows(B, F, x_bytes, out_bytes, fixed, row_extra, budget)
    num_tiles = pl.cdiv(B, TB)

    # VMEM estimate counts 2 buffers for every pipelined operand + output tiles.
    est = fixed + TB * (2 * F * x_bytes + row_extra + 2 * out_bytes)
    vmem_limit = int(min(0.92 * vmem_cap, max(16 << 20, 1.25 * est + (1 << 20))))

    compiler_params = pltpu.CompilerParams(
        dimension_semantics=("parallel",),     # v7x: split the batch across both TCs
        vmem_limit_bytes=vmem_limit,
    )

    out_shape = jax.ShapeDtypeStruct((num_tiles, 1, TB), out_dtype)
    out_spec = pl.BlockSpec((1, 1, TB), lambda i: (i, 0, 0))

    if conditional:
        y_col = y.astype(jnp.int32).reshape(B, 1)
        cost = pl.CostEstimate(
            flops=int(2 * B * F * (1 + C)),
            transcendentals=0,
            bytes_accessed=int(B * F * x_bytes + B * 4 + C * F * e_bytes + B * out_bytes),
        )
        out = pl.pallas_call(
            _disc_proj_kernel,
            out_shape=out_shape,
            grid_spec=pltpu.PrefetchScalarGridSpec(
                num_scalar_prefetch=0,
                grid=(num_tiles,),
                in_specs=[
                    pl.BlockSpec((TB, F), lambda i: (i, 0)),            # x tile
                    pl.BlockSpec((TB, 1), lambda i: (i, 0)),            # label column tile
                    pl.BlockSpec((C, F), lambda i: (0, 0)),             # folded table (invariant)
                    pl.BlockSpec(memory_space=pltpu.MemorySpace.SMEM),  # bias scalar
                ],
                out_specs=out_spec,
            ),
            compiler_params=compiler_params,
            cost_estimate=cost,
        )(inputs, y_col, e2, b_smem)
    else:
        cost = pl.CostEstimate(
            flops=int(2 * B * F),
            transcendentals=0,
            bytes_accessed=int(B * F * x_bytes + F * x_bytes + B * out_bytes),
        )
        out = pl.pallas_call(
            _disc_linear_kernel,
            out_shape=out_shape,
            grid_spec=pltpu.PrefetchScalarGridSpec(
                num_scalar_prefetch=0,
                grid=(num_tiles,),
                in_specs=[
                    pl.BlockSpec((TB, F), lambda i: (i, 0)),            # x tile
                    pl.BlockSpec((1, F), lambda i: (0, 0)),             # weight row (invariant)
                    pl.BlockSpec(memory_space=pltpu.MemorySpace.SMEM),  # bias scalar
                ],
                out_specs=out_spec,
            ),
            compiler_params=compiler_params,
            cost_estimate=cost,
        )(inputs, w_row, b_smem)

    # Lane-dense (num_tiles, 1, TB) slab -> [B, 1]; out-of-range rows of the last
    # (unpadded) tile hold unspecified values and are dropped here.
    return out.reshape(num_tiles * TB)[:B].reshape(B, 1)


def linear_discriminator(inputs, weight, bias, embedding=None, y=None,
                         *, min_pallas_elements=1 << 18):
    """Dispatcher: tiny problems go to fused XLA (Pallas per-step/DMA overhead
    dwarfs ~KBs of work); bandwidth-bound sizes go to the Pallas kernel."""
    if inputs.size < min_pallas_elements:
        d = inputs @ weight.reshape(-1, 1) + bias.reshape(1, 1)
        if y is not None and embedding is not None:
            d = d + jnp.sum(inputs * jnp.take(embedding, y, axis=0),
                            axis=1, keepdims=True)
        return d.astype(inputs.dtype)
    return linear_discriminator_pallas(inputs, weight, bias, embedding, y)


if __name__ == "__main__":
    F, NCLS = 128, 4

    key = jax.random.PRNGKey(0)
    k_x, k_w, k_b, k_e, k_y, k_x2 = jax.random.split(key, 6)

    bound = 1.0 / (F ** 0.5)
    weight = jax.random.uniform(k_w, (1, F), jnp.float32, -bound, bound)   # nn.Linear.weight
    bias = jax.random.uniform(k_b, (1,), jnp.float32, -bound, bound)       # nn.Linear.bias
    embedding = jax.random.normal(k_e, (NCLS, F), jnp.float32)             # nn.Embedding.weight

    # Conditional path with a non-divisible batch (exercises the no-pad,
    # partial-last-block path): B=200 -> TB=128, grid=(2,).
    B = 200
    inputs = jax.random.normal(k_x, (B, F), jnp.float32)
    y = jax.random.randint(k_y, (B,), 0, NCLS, jnp.int32)

    out = jax.block_until_ready(
        linear_discriminator_pallas(inputs, weight, bias, embedding, y))
    ref = inputs @ weight.T + bias
    ref = ref + jnp.sum(inputs * jnp.take(embedding, y, axis=0), axis=1, keepdims=True)
    assert out.shape == (B, 1)
    assert jnp.allclose(out, ref, atol=2e-3, rtol=2e-3)

    # Unconditional path (y=None), small awkward batch in a single full-extent block.
    B2 = 50
    inputs2 = jax.random.normal(k_x2, (B2, F), jnp.float32)
    out_none = jax.block_until_ready(
        linear_discriminator_pallas(inputs2, weight, bias))
    ref_none = inputs2 @ weight.T + bias
    assert out_none.shape == (B2, 1)
    assert jnp.allclose(out_none, ref_none, atol=2e-3, rtol=2e-3)

    print("KERNEL_OK")
</pallas_src>

<mosaic_0001>
module attributes {stable_mosaic.version = 11 : i64} {
  func.func @_disc_proj_kernel(%arg0: i32, %arg1: memref<128x128xf32, #tpu.memory_space<vmem>>, %arg2: memref<128x1xi32, #tpu.memory_space<vmem>>, %arg3: memref<4x128xf32, #tpu.memory_space<vmem>>, %arg4: memref<1xf32, #tpu.memory_space<smem>>, %arg5: memref<1x1x128xf32, #tpu.memory_space<vmem>>) attributes {dimension_semantics = [#tpu.dimension_semantics<parallel>], iteration_bounds = array<i64: 2>, scalar_prefetch = 0 : i64, scratch_operands = 0 : i64, tpu.core_type = #tpu.core_type<tc>, window_params = [{transform_indices = @transform_0, window_bounds = array<i64: 128, 128>}, {transform_indices = @transform_1, window_bounds = array<i64: 128, 1>}, {pipeline_mode = #tpu.pipeline_mode<synchronous>, transform_indices = @transform_2, window_bounds = array<i64: 4, 128>}, {transform_indices = @transform_3, window_bounds = array<i64: 1>}, {transform_indices = @transform_4, window_bounds = array<i64: 1, 1, 128>}]} {
    %0 = tpu.iota {dimensions = array<i32: 1>} : vector<128x4xi32>
    %c0 = arith.constant 0 : index
    %c0_0 = arith.constant 0 : index
    %1 = vector.load %arg2[%c0, %c0_0] : memref<128x1xi32, #tpu.memory_space<vmem>>, vector<128x1xi32>
    %2 = vector.broadcast %1 : vector<128x1xi32> to vector<128x4xi32>
    %3 = arith.cmpi eq, %2, %0 : vector<128x4xi32>
    %4 = arith.extui %3 : vector<128x4xi1> to vector<128x4xi32>
    %5 = arith.sitofp %4 : vector<128x4xi32> to vector<128x4xf32>
    %c0_1 = arith.constant 0 : index
    %c0_2 = arith.constant 0 : index
    %6 = vector.load %arg3[%c0_1, %c0_2] : memref<4x128xf32, #tpu.memory_space<vmem>>, vector<4x128xf32>
    %cst = arith.constant dense<0.000000e+00> : vector<128x128xf32>
    %7 = tpu.matmul %5, %6, %cst {dimension_numbers = #tpu.dot_dimension_numbers<[1], [0], [0], [1], [0, 0, 1, 1], [], []>} : vector<128x4xf32>, vector<4x128xf32>, vector<128x128xf32> -> vector<128x128xf32>
    %c0_3 = arith.constant 0 : index
    %c0_4 = arith.constant 0 : index
    %8 = vector.load %arg1[%c0_3, %c0_4] : memref<128x128xf32, #tpu.memory_space<vmem>>, vector<128x128xf32>
    %9 = arith.mulf %8, %7 : vector<128x128xf32>
    %cst_5 = arith.constant dense<0.000000e+00> : vector<128xf32>
    %10 = vector.multi_reduction <add>, %9, %cst_5 [1] : vector<128x128xf32> to vector<128xf32>
    %11 = vector.shape_cast %10 : vector<128xf32> to vector<128x1xf32>
    %c0_6 = arith.constant 0 : index
    %12 = memref.load %arg4[%c0_6] : memref<1xf32, #tpu.memory_space<smem>>
    %13 = vector.broadcast %12 : f32 to vector<128x1xf32>
    %14 = arith.addf %11, %13 : vector<128x1xf32>
    %15 = tpu.transpose %14, [1, 0] : vector<128x1xf32> -> vector<1x128xf32>
    %16 = vector.shape_cast %15 : vector<1x128xf32> to vector<1x1x128xf32>
    %c0_7 = arith.constant 0 : index
    %c0_8 = arith.constant 0 : index
    %c0_9 = arith.constant 0 : index
    %17 = vector.load %arg5[%c0_7, %c0_8, %c0_9] : memref<1x1x128xf32, #tpu.memory_space<vmem>>, vector<1x1x128xf32>
    tpu.vector_store %arg5[%c0_7, %c0_8, %c0_9], %16 {strides = array<i32>} : memref<1x1x128xf32, #tpu.memory_space<vmem>>, vector<1x1x128xf32>,
    return
  }
  func.func @transform_0(%arg0: i32) -> (i32, i32) {
    %c0_i32 = arith.constant 0 : i32
    %c0_i32_0 = arith.constant 0 : i32
    return %arg0, %c0_i32 : i32, i32
  }
  func.func @transform_1(%arg0: i32) -> (i32, i32) {
    %c0_i32 = arith.constant 0 : i32
    %c0_i32_0 = arith.constant 0 : i32
    return %arg0, %c0_i32 : i32, i32
  }
  func.func @transform_2(%arg0: i32) -> (i32, i32) {
    %c0_i32 = arith.constant 0 : i32
    %c0_i32_0 = arith.constant 0 : i32
    %c0_i32_1 = arith.constant 0 : i32
    return %c0_i32, %c0_i32_0 : i32, i32
  }
  func.func @transform_3(%arg0: i32) -> i32 {
    %c0_i32 = arith.constant 0 : i32
    %c0_i32_0 = arith.constant 0 : i32
    return %c0_i32 : i32
  }
  func.func @transform_4(%arg0: i32) -> (i32, i32, i32) {
    %c0_i32 = arith.constant 0 : i32
    %c0_i32_0 = arith.constant 0 : i32
    %c0_i32_1 = arith.constant 0 : i32
    return %arg0, %c0_i32, %c0_i32_0 : i32, i32, i32
  }
}

</mosaic_0001>

<bundles_post_ra>
// kernel: tpu_custom_call.1
= control target key start
LH: loop header
LB: loop body
LE: loop exit
PB: predicated region body
PF: predicated region fallthrough
CT: control target
= control target key end

     0   :  { %s1177_s0 = inlined_call_operand.vmem [shape: f32[200,128], index: 0, kind: input, shape index: {}]   ;;  %s1178_s1 = inlined_call_operand.vmem [shape: s32[200,1], index: 1, kind: input, shape index: {}]   ;;  %s1179_s2 = inlined_call_operand.vmem [shape: f32[4,128], index: 2, kind: input, shape index: {}]   ;;  %s1180_s3 = inlined_call_operand.<no memory space> [shape: f32[1], index: 3, kind: input, shape index: {}]   ;;  %s1181_s4 = inlined_call_operand.hbm [shape: f32[2,1,128], index: 4, kind: output, shape index: {}]  }
   0x1   :  { %9 = sst [smem:[#allocation2]] %s1180_s3 }
   0x2   :  { %10 = vsyncpa [#allocation4], 0 }
   0x3   :  { %12 = vsyncpa [#allocation4 + $0x1], 0  ;;  %s995_s17 = smov 0   ;;  %s997_s18 = smov 0  }
   0x4   :  { %s999_s19 = smov 0   ;;  %s1001_s20 = smov 0  }
   0x5 LB: > { %s767_s3 = sadd.s32 4294967295, %s962_s20   ;;  %s768_s21 = sadd.s32 4294967294, %s962_s20   ;;  %s962_s20 = sphi %s1001_s20, %s1187_s20   ;;  %s958_s19 = sphi %s999_s19, %s1186_s19   ;;  %s954_s18 = sphi %s997_s18, %s1185_s18   ;;  %s950_s17 = sphi %s995_s17, %s1184_s17  }
   0x6   : > { %s1018_s22 = sadd.s32 1, %s962_s20   ;;  %s119_s23 = sadd.s32 1, %s958_s19 }
   0x7   : > { %s116_s24 = ssub.s32 %s962_s20, %s1018_s22  ;;  %p129_p0 = scmp.ne.s32.totalorder %s958_s19, %s954_s18 }
   0x8   : > { %p117_p1 = scmp.eq.s32.totalorder %s116_s24, 0  ;;  %p130_p2 = scmp.eq.s32.totalorder %s767_s3, 1 }
   0x9   : > { %p135_p3 = scmp.ne.s32.totalorder %s954_s18, %s950_s17  ;;  %p136_p4 = scmp.eq.s32.totalorder %s768_s21, 1 }
   0xa   : > { %s1028_s25 = scalar_select %p117_p1, %s958_s19, %s119_s23  }
   0xb   : > { %p1030_p5 = por %p130_p2, %p129_p0  ;;  %p1034_p6 = por %p136_p4, %p135_p3 }
   0xc   : > { %p771_p7 = scmp.ge.s32.totalorder %s962_s20, 1  ;;  %p194_p8 = scmp.lt.s32.totalorder %s962_s20, 3 }
   0xe   : > { %p195_p9 = pnand %p771_p7, %p194_p8 }
   0xf   : > { %s1040_s28 = sshll.u32 (!%p195_p9), %s767_s3, 4  ;;  %v964_v0 = vmov (!%p195_p9), 0   ;;  %vm424_vm0 = vcmask (!%p195_p9), 1043456   ;;  %v374_v5 = vld [vmem:[%s1179_s2] sm:$0xf] (!%p195_p9)  ;;  %v260_v18 = vlaneseq (!%p195_p9)  ;;  %vm375_vm1 = vcmask (!%p195_p9), 31744  }
  0x10   : > { %198 = sbr.rel (%p195_p9) target bundleno = 669 (0x29d), region = 36  ;;  %899 = vset.pattern.permute.xlu1 (!%p195_p9), %v964_v0  ;;  %898 = vset.pattern.permute.xlu0 (!%p195_p9), %v964_v0  ;;  %p237_p10 = scmp.lt.s32.totalorder (!%p195_p9), %s1040_s28, 24  ;;  %v965_v22 = vmov (!%p195_p9), 0.0  }
  0x11   : > { %829 = vmatprep.subr.msk.mxu0 (!%p195_p9), %vm424_vm0, %v374_v5  ;;  %855 = vmatprep.subr.msk.mxu1 (!%p195_p9), %vm424_vm0, %v374_v5  ;;  %v1073_v19 = vand.u32 (!%p195_p9), 127, %v260_v18  ;;  %s637_s13 = sld [smem:[#allocation2]] (!%p195_p9)  ;;  %s230_s14 = sand.u32 (!%p195_p9), 1, %s954_s18  }
  0x12   : > { %830 = vmatpush3.msk.msra.mxu0 (!%p195_p9), %vm424_vm0, %v374_v5  ;;  %856 = vmatpush3.msk.msra.mxu1 (!%p195_p9), %vm424_vm0, %v374_v5  ;;  %s231_s15 = scalar_lea.vmem (!%p195_p9), [#allocation3], %s230_s14  ;;  %s1137_s23 = scalar_lea.hbm (!%p195_p9), %s1181_s4, %s1040_s28 }
  0x13   : > { %s701_s16 = sshll.u32 (!%p195_p9), %s231_s15, 4  ;;  %s689_s24 = scalar_lea.sflag (!%p195_p9), [#allocation4], %s230_s14  ;;  %s1131_s16 = int_to_ptr.vmem [resolvable:$true] %s701_s16 }
  0x17   : > { %s1044_s29 = scalar_select %p237_p10, %s1040_s28, 24 }
  0x19   : > { %s773_s30 = sshll.u32 %s1044_s29, 3  ;;  %s900_s29 = scalar_lea.vmem %s1131_s16, 16 }
  0x1a   : > { %s1052_s7 = scalar_lea.vmem %s1178_s1, %s773_s30  ;;  %s1112_s12 = scalar_lea.vmem %s1177_s0, %s773_s30 }
  0x1b   : > { %v264_v1 = vld [vmem:[%s1052_s7 + $0x10] sm:$0xff]  ;;  %v262_v2 = vld [vmem:[%s1052_s7] sm:$0xff]  ;;  %v265_v3 = vld [vmem:[%s1052_s7 + $0x18] sm:$0xff]  ;;  %p901_p11 = scmp.ne.s32.totalorder %s1131_s16, %s900_s29  ;;  %s966_s30 = smov [#allocation3]  }
  0x1c   : > { %285 = vperm.xlu1 %899, %v264_v1   ;;  %279 = vperm.xlu0 %898, %v262_v2   ;;  %v263_v4 = vld [vmem:[%s1052_s7 + $0x8] sm:$0xff]  ;;  %v266_v7 = vld [vmem:[%s1052_s7 + $0x20] sm:$0xff]  ;;  %v269_v8 = vld [vmem:[%s1052_s7 + $0x38] sm:$0xff]  ;;  %s904_s5 = sshll.u32 %s966_s30, 4  ;;  %s905_s5 = int_to_ptr.vmem [resolvable:$false] %s904_s5 }
  0x1d   : > { %v267_v6 = vld [vmem:[%s1052_s7 + $0x28] sm:$0xff]  ;;  %v268_v9 = vld [vmem:[%s1052_s7 + $0x30] sm:$0xff]  ;;  %v270_v11 = vld [vmem:[%s1052_s7 + $0x40] sm:$0xff]  ;;  %p902_p12 = pnand %p901_p11, %p1030_p5  ;;  %s906_s6 = scalar_lea.vmem %s905_s5, 32 }
  0x1e   : > { %v271_v10 = vld [vmem:[%s1052_s7 + $0x48] sm:$0xff]  ;;  %v273_v12 = vld [vmem:[%s1052_s7 + $0x58] sm:$0xff]  ;;  %v272_v13 = vld [vmem:[%s1052_s7 + $0x50] sm:$0xff]  ;;  %p907_p0 = scmp.lt.s32.totalorder %s1131_s16, %s905_s5  ;;  %p908_p1 = scmp.lt.s32.totalorder %s906_s6, %s900_s29 }
  0x1f   : > { %v275_v14 = vld [vmem:[%s1052_s7 + $0x68] sm:$0xff]  ;;  %v274_v15 = vld [vmem:[%s1052_s7 + $0x60] sm:$0xff]  ;;  %v277_v16 = vld [vmem:[%s1052_s7 + $0x78] sm:$0xff]  ;;  %p903_p13 = pneg %p902_p12 }
  0x20   : > { %288 = vperm.xlu1 %899, %v265_v3   ;;  %282 = vperm.xlu0 %898, %v263_v4   ;;  %v276_v17 = vld [vmem:[%s1052_s7 + $0x70] sm:$0xff]  ;;  %v574_v53 = vld [vmem:[%s1112_s12 + $0x8] sm:$0xff]  ;;  %v573_v54 = vld [vmem:[%s1112_s12] sm:$0xff]  ;;  %p909_p2 = por %p908_p1, %p907_p0 }
  0x21   : > { %v576_v59 = vld [vmem:[%s1112_s12 + $0x18] sm:$0xff]  ;;  %v575_v60 = vld [vmem:[%s1112_s12 + $0x10] sm:$0xff]  ;;  %v578_v1 = vld [vmem:[%s1112_s12 + $0x28] sm:$0xff] }
  0x22   : > { %v577_v2 = vld [vmem:[%s1112_s12 + $0x20] sm:$0xff]  ;;  %p910_p3 = pnand %p909_p2, %p903_p13 }
  0x24   : > { %294 = vperm.xlu1 %899, %v267_v6   ;;  %291 = vperm.xlu0 %898, %v266_v7   ;;  %v580_v7 = vld [vmem:[%s1112_s12 + $0x38] sm:$0xff] }
  0x28   : > { %300 = vperm.xlu1 %899, %v269_v8   ;;  %297 = vperm.xlu0 %898, %v268_v9   ;;  %v579_v8 = vld [vmem:[%s1112_s12 + $0x30] sm:$0xff]  ;;  %v582_v9 = vld [vmem:[%s1112_s12 + $0x48] sm:$0xff] }
  0x2c   : > { %306 = vperm.xlu1 %899, %v271_v10   ;;  %303 = vperm.xlu0 %898, %v270_v11   ;;  %v581_v11 = vld [vmem:[%s1112_s12 + $0x40] sm:$0xff] }
  0x30   : > { %312 = vperm.xlu1 %899, %v273_v12   ;;  %309 = vperm.xlu0 %898, %v272_v13  }
  0x34   : > { %318 = vperm.xlu1 %899, %v275_v14   ;;  %315 = vperm.xlu0 %898, %v274_v15  }
  0x38   : > { %324 = vperm.xlu1 %899, %v277_v16   ;;  %321 = vperm.xlu0 %898, %v276_v17  }
  0x9b   : > { %v286_v20 = vpop.permute.xlu1 %285  ;;  %v280_v21 = vpop.permute.xlu0 %279 }
  0x9c   : > { %vm326_vm2 = vcmp.eq.s32.totalorder %v280_v21, %v1073_v19  ;;  %vm328_vm3 = vcmp.eq.s32.totalorder %v286_v20, %v1073_v19  ;;  %v583_v20 = vld [vmem:[%s1112_s12 + $0x50] sm:$0xff] }
  0x9d   : > { %v776_v23 = vsel %vm326_vm2, 1.0, %v965_v22  ;;  %v778_v27 = vsel %vm328_vm3, 1.0, %v965_v22 }
  0x9e   : > { %831 = vmatprep.mubr.msk.f32.mxu0 %vm375_vm1, %v776_v23 }
  0x9f   : > { %v289_v24 = vpop.permute.xlu1 %288  ;;  %v283_v25 = vpop.permute.xlu0 %282 }
  0xa0   : > { %vm327_vm4 = vcmp.eq.s32.totalorder %v283_v25, %v1073_v19  ;;  %vm329_vm5 = vcmp.eq.s32.totalorder %v289_v24, %v1073_v19  ;;  %v586_v25 = vld [vmem:[%s1112_s12 + $0x68] sm:$0xff] }
  0xa1   : > { %v777_v26 = vsel %vm327_vm4, 1.0, %v965_v22  ;;  %v779_v30 = vsel %vm329_vm5, 1.0, %v965_v22 }
  0xa2   : > { %832 = vmatmul.mubr.msk.f32.vlgmr.msra.gmra.mrb[0].mxu0 %vm375_vm1, %v777_v26  ;;  %v585_v26 = vld [vmem:[%s1112_s12 + $0x60] sm:$0xff] }
  0xa3   : > { %v295_v28 = vpop.permute.xlu1 %294  ;;  %834 = vmatprep.mubr.msk.f32.mxu0 %vm375_vm1, %v778_v27  ;;  %v292_v29 = vpop.permute.xlu0 %291 }
  0xa4   : > { %vm330_vm6 = vcmp.eq.s32.totalorder %v292_v29, %v1073_v19  ;;  %vm331_vm7 = vcmp.eq.s32.totalorder %v295_v28, %v1073_v19 }
  0xa5   : > { %v780_v31 = vsel %vm330_vm6, 1.0, %v965_v22  ;;  %v781_v34 = vsel %vm331_vm7, 1.0, %v965_v22 }
  0xa6   : > { %835 = vmatmul.mubr.msk.f32.gmra.mrb[2].mxu0 %vm375_vm1, %v779_v30 }
  0xa7   : > { %v301_v32 = vpop.permute.xlu1 %300  ;;  %837 = vmatprep.mubr.msk.f32.mxu0 %vm375_vm1, %v780_v31  ;;  %v298_v33 = vpop.permute.xlu0 %297  ;;  %v588_v31 = vld [vmem:[%s1112_s12 + $0x78] sm:$0xff] }
  0xa8   : > { %vm332_vm8 = vcmp.eq.s32.totalorder %v298_v33, %v1073_v19  ;;  %vm333_vm9 = vcmp.eq.s32.totalorder %v301_v32, %v1073_v19  ;;  %v587_v32 = vld [vmem:[%s1112_s12 + $0x70] sm:$0xff] }
  0xa9   : > { %v782_v35 = vsel %vm332_vm8, 1.0, %v965_v22  ;;  %v783_v38 = vsel %vm333_vm9, 1.0, %v965_v22 }
  0xaa   : > { %838 = vmatmul.mubr.msk.f32.gmra.mrb[4].mxu0 %vm375_vm1, %v781_v34 }
  0xab   : > { %v307_v36 = vpop.permute.xlu1 %306  ;;  %840 = vmatprep.mubr.msk.f32.mxu0 %vm375_vm1, %v782_v35  ;;  %v304_v37 = vpop.permute.xlu0 %303 }
  0xac   : > { %vm335_vm10 = vcmp.eq.s32.totalorder %v307_v36, %v1073_v19  ;;  %vm334_vm11 = vcmp.eq.s32.totalorder %v304_v37, %v1073_v19  ;;  %v638_v37 = vstv %s637_s13 }
  0xad   : > { %v785_v39 = vsel %vm335_vm10, 1.0, %v965_v22  ;;  %v784_v40 = vsel %vm334_vm11, 1.0, %v965_v22 }
  0xae   : > { %841 = vmatmul.mubr.msk.f32.gmra.mrb[6].mxu0 %vm375_vm1, %v783_v38  ;;  %843 = vmatprep.mubr.msk.f32.mxu1 %vm375_vm1, %v784_v40 }
  0xaf   : > { %v313_v41 = vpop.permute.xlu1 %312  ;;  %844 = vmatmul.mubr.msk.f32.vlgmr.msra.gmra.mrb[0].mxu1 %vm375_vm1, %v785_v39  ;;  %v310_v42 = vpop.permute.xlu0 %309 }
  0xb0   : > { %vm337_vm12 = vcmp.eq.s32.totalorder %v313_v41, %v1073_v19  ;;  %vm336_vm13 = vcmp.eq.s32.totalorder %v310_v42, %v1073_v19 }
  0xb1   : > { %v787_v43 = vsel %vm337_vm12, 1.0, %v965_v22  ;;  %v786_v44 = vsel %vm336_vm13, 1.0, %v965_v22 }
  0xb2   : > { %846 = vmatprep.mubr.msk.f32.mxu1 %vm375_vm1, %v786_v44 }
  0xb3   : > { %v319_v45 = vpop.permute.xlu1 %318  ;;  %847 = vmatmul.mubr.msk.f32.gmra.mrb[2].mxu1 %vm375_vm1, %v787_v43  ;;  %v316_v46 = vpop.permute.xlu0 %315 }
  0xb4   : > { %vm339_vm14 = vcmp.eq.s32.totalorder %v319_v45, %v1073_v19  ;;  %vm338_vm15 = vcmp.eq.s32.totalorder %v316_v46, %v1073_v19 }
  0xb5   : > { %v789_v47 = vsel %vm339_vm14, 1.0, %v965_v22  ;;  %v788_v48 = vsel %vm338_vm15, 1.0, %v965_v22 }
  0xb6   : > { %849 = vmatprep.mubr.msk.f32.mxu1 %vm375_vm1, %v788_v48 }
  0xb7   : > { %v325_v49 = vpop.permute.xlu1 %324  ;;  %850 = vmatmul.mubr.msk.f32.gmra.mrb[4].mxu1 %vm375_vm1, %v789_v47  ;;  %v322_v50 = vpop.permute.xlu0 %321 }
  0xb8   : > { %vm341_vm0 = vcmp.eq.s32.totalorder %v325_v49, %v1073_v19  ;;  %vm340_vm2 = vcmp.eq.s32.totalorder %v322_v50, %v1073_v19  ;;  %v584_v19 = vld [vmem:[%s1112_s12 + $0x58] sm:$0xff] }
  0xb9   : > { %v791_v51 = vsel %vm341_vm0, 1.0, %v965_v22  ;;  %v790_v52 = vsel %vm340_vm2, 1.0, %v965_v22 }
  0xba   : > { %852 = vmatprep.mubr.msk.f32.mxu1 %vm375_vm1, %v790_v52 }
  0xbb   : > { %853 = vmatmul.mubr.msk.f32.gmra.mrb[6].mxu1 %vm375_vm1, %v791_v51 }
 0x175   : > { %v833_v55 = vpop.f32.mrb[0].mxu0 }
 0x176   : > { %v590_v56 = vmul.f32 %v833_v55, %v574_v53  ;;  %v494_v57 = vpop.f32.mrb[1].mxu0 }
 0x177   : > { %v589_v58 = vmul.f32 %v573_v54, %v494_v57 }
 0x178   : > { %607 = vadd.xlane.f32.xlu1 %v590_v56 }
 0x179   : > { %v836_v61 = vpop.f32.mrb[2].mxu0  ;;  %605 = vadd.xlane.f32.xlu0 %v589_v58 }
 0x17a   : > { %v592_v62 = vmul.f32 %v836_v61, %v576_v59  ;;  %v504_v63 = vpop.f32.mrb[3].mxu0 }
 0x17b   : > { %v591_v0 = vmul.f32 %v575_v60, %v504_v63 }
 0x17d   : > { %v839_v3 = vpop.f32.mrb[4].mxu0  ;;  %609 = vadd.xlane.f32.xlu0 %v591_v0 }
 0x17e   : > { %v594_v4 = vmul.f32 %v839_v3, %v578_v1  ;;  %v514_v5 = vpop.f32.mrb[5].mxu0 }
 0x17f   : > { %v593_v6 = vmul.f32 %v577_v2, %v514_v5 }
 0x181   : > { %v842_v10 = vpop.f32.mrb[6].mxu0  ;;  %611 = vadd.xlane.f32.xlu0 %v592_v62 }
 0x182   : > { %v596_v12 = vmul.f32 %v842_v10, %v580_v7  ;;  %v524_v13 = vpop.f32.mrb[7].mxu0  ;;  %v845_v14 = vpop.f32.mrb[0].mxu1 }
 0x183   : > { %v595_v15 = vmul.f32 %v579_v8, %v524_v13  ;;  %v598_v16 = vmul.f32 %v845_v14, %v582_v9  ;;  %v534_v17 = vpop.f32.mrb[1].mxu1 }
 0x184   : > { %v597_v18 = vmul.f32 %v581_v11, %v534_v17 }
 0x185   : > { %615 = vadd.xlane.f32.xlu0 %v594_v4 }
 0x186   : > { %v848_v21 = vpop.f32.mrb[2].mxu1  ;;  %621 = vadd.xlane.f32.xlu1 %v597_v18 }
 0x187   : > { %v600_v22 = vmul.f32 %v848_v21, %v584_v19  ;;  %v544_v23 = vpop.f32.mrb[3].mxu1 }
 0x188   : > { %v599_v24 = vmul.f32 %v583_v20, %v544_v23 }
 0x189   : > { %619 = vadd.xlane.f32.xlu0 %v596_v12 }
 0x18a   : > { %v851_v27 = vpop.f32.mrb[4].mxu1  ;;  %613 = vadd.xlane.f32.xlu1 %v593_v6 }
 0x18b   : > { %v602_v28 = vmul.f32 %v851_v27, %v586_v25  ;;  %v554_v29 = vpop.f32.mrb[5].mxu1 }
 0x18c   : > { %v601_v30 = vmul.f32 %v585_v26, %v554_v29 }
 0x18d   : > { %623 = vadd.xlane.f32.xlu0 %v598_v16 }
 0x18e   : > { %v854_v33 = vpop.f32.mrb[6].mxu1  ;;  %625 = vadd.xlane.f32.xlu1 %v599_v24 }
 0x18f   : > { %v604_v34 = vmul.f32 %v854_v33, %v588_v31  ;;  %v564_v35 = vpop.f32.mrb[7].mxu1 }
 0x190   : > { %v603_v36 = vmul.f32 %v587_v32, %v564_v35 }
 0x191   : > { %627 = vadd.xlane.f32.xlu0 %v600_v22 }
 0x192   : > { %629 = vadd.xlane.f32.xlu1 %v601_v30 }
 0x195   : > { %631 = vadd.xlane.f32.xlu0 %v602_v28 }
 0x196   : > { %617 = vadd.xlane.f32.xlu1 %v595_v15 }
 0x199   : > { %635 = vadd.xlane.f32.xlu0 %v604_v34 }
 0x19a   : > { %633 = vadd.xlane.f32.xlu1 %v603_v36 }
 0x205   : > { %v608_v40 = vpop.xlane.xlu1 %607 }
 0x206   : > { %v606_v38 = vpop.xlane.xlu0 %605  ;;  %v640_v42 = vadd.f32 %v638_v37, %v608_v40 }
 0x207   : > { %v639_v39 = vadd.f32 %v638_v37, %v606_v38 }
 0x209   : > { %655 = vxpose.xlu1.b32.start [1/16] (narrow) %v639_v39, 8 }
 0x20a   : > { %v610_v41 = vpop.xlane.xlu0 %609 }
 0x20b   : > { %v641_v43 = vadd.f32 %v638_v37, %v610_v41 }
 0x20d   : > { %656 = vxpose.xlu1.b32.cont [2/16] (narrow) %v640_v42, 8 }
 0x20e   : > { %v612_v44 = vpop.xlane.xlu0 %611 }
 0x20f   : > { %v642_v45 = vadd.f32 %v638_v37, %v612_v44 }
 0x211   : > { %657 = vxpose.xlu1.b32.cont [3/16] (narrow) %v641_v43, 8 }
 0x212   : > { %v616_v49 = vpop.xlane.xlu0 %615 }
 0x213   : > { %v622_v46 = vpop.xlane.xlu1 %621  ;;  %v644_v51 = vadd.f32 %v638_v37, %v616_v49 }
 0x214   : > { %v647_v57 = vadd.f32 %v638_v37, %v622_v46 }
 0x215   : > { %658 = vxpose.xlu1.b32.cont [4/16] (narrow) %v642_v45, 8 }
 0x216   : > { %v620_v55 = vpop.xlane.xlu0 %619 }
 0x217   : > { %v614_v47 = vpop.xlane.xlu1 %613  ;;  %v646_v56 = vadd.f32 %v638_v37, %v620_v55 }
 0x218   : > { %v643_v48 = vadd.f32 %v638_v37, %v614_v47 }
 0x21a   : > { %659 = vxpose.xlu1.b32.cont [5/16] (narrow) %v643_v48, 8  ;;  %v624_v58 = vpop.xlane.xlu0 %623 }
 0x21b   : > { %v626_v50 = vpop.xlane.xlu1 %625  ;;  %v648_v59 = vadd.f32 %v638_v37, %v624_v58 }
 0x21c   : > { %v649_v60 = vadd.f32 %v638_v37, %v626_v50 }
 0x21e   : > { %660 = vxpose.xlu1.b32.cont [6/16] (narrow) %v644_v51, 8  ;;  %v628_v61 = vpop.xlane.xlu0 %627 }
 0x21f   : > { %v630_v52 = vpop.xlane.xlu1 %629  ;;  %v650_v62 = vadd.f32 %v638_v37, %v628_v61 }
 0x220   : > { %v651_v63 = vadd.f32 %v638_v37, %v630_v52 }
 0x222   : > { %v632_v0 = vpop.xlane.xlu0 %631 }
 0x223   : > { %v618_v53 = vpop.xlane.xlu1 %617  ;;  %v652_v1 = vadd.f32 %v638_v37, %v632_v0 }
 0x224   : > { %v645_v54 = vadd.f32 %v638_v37, %v618_v53 }
 0x226   : > { %661 = vxpose.xlu1.b32.cont [7/16] (narrow) %v645_v54, 8  ;;  %v636_v4 = vpop.xlane.xlu0 %635 }
 0x227   : > { %v634_v2 = vpop.xlane.xlu1 %633  ;;  %v654_v5 = vadd.f32 %v638_v37, %v636_v4 }
 0x228   : > { %v653_v3 = vadd.f32 %v638_v37, %v634_v2 }
 0x22a   : > { %662 = vxpose.xlu1.b32.cont [8/16] (narrow) %v646_v56, 8 }
 0x22e   : > { %663 = vxpose.xlu1.b32.cont [9/16] (narrow) %v647_v57, 8 }
 0x232   : > { %664 = vxpose.xlu1.b32.cont [10/16] (narrow) %v648_v59, 8 }
 0x236   : > { %665 = vxpose.xlu1.b32.cont [11/16] (narrow) %v649_v60, 8 }
 0x23a   : > { %666 = vxpose.xlu1.b32.cont [12/16] (narrow) %v650_v62, 8 }
 0x23e   : > { %667 = vxpose.xlu1.b32.cont [13/16] (narrow) %v651_v63, 8 }
 0x242   : > { %668 = vxpose.xlu1.b32.cont [14/16] (narrow) %v652_v1, 8 }
 0x246   : > { %669 = vxpose.xlu1.b32.cont [15/16] (narrow) %v653_v3, 8 }
 0x24a   : > { %670 = vxpose.xlu1.b32.end [16/16] (narrow) %v654_v5, 8 }
 0x28e   : > { %v671_v6 = vpop.trf.xlu1 }
 0x28f   : > { %687 = vst [vmem:[%s231_s15] sm:$0x1] %v671_v6 }
 0x290   : > { %913 = shalt.err (!%p910_p3)
}
 0x291   : > { %s914_s28 = scalar_lea.hbm %s1137_s23, 16  ;;  %s918_s9 = scalar_lea.hbm %s1181_s4, 32 }
 0x292   : > { %p915_p4 = scmp.ne.s32.totalorder %s1137_s23, %s914_s28  ;;  %p919_p9 = scmp.lt.u32.totalorder %s1137_s23, %s1181_s4 }
 0x293   : > { %p920_p10 = scmp.lt.u32.totalorder %s918_s9, %s914_s28  ;;  %p922_p12 = scmp.lt.u32.totalorder %s914_s28, %s1137_s23 }
 0x294   : > { %p916_p7 = pnand %p915_p4, %p1030_p5 }
 0x295   : > { %p921_p11 = por %p920_p10, %p919_p9 }
 0x296   : > { %p917_p8 = pneg %p916_p7 }
 0x297   : > { %p923_p13 = por %p922_p12, %p921_p11 }
 0x299   : > { %p924_p0 = pnand %p923_p13, %p917_p8 }
 0x29b   : > { %927 = shalt.err (!%p924_p0)
}
 0x29c   : > { %857 = dma.vmem_to_hbm [thread:$0]  (%p1030_p5), %s1131_s16, 16, %s1137_s23, %s689_s24  }
 0x29d PF: > { %p863_p1 = scmp.ge.s32.totalorder %s962_s20, 2  ;;  %s713_s12 = sand.u32 1, %s950_s17  }
 0x29e   : > { %s714_s13 = scalar_lea.sflag [#allocation4], %s713_s12 }
 0x29f   : > { %p860_p2 = pnand %p863_p1, %p1034_p6 }
 0x2a1   : > { %945 = dma.done.wait (!%p860_p2), %s714_s13, 16  }
 0x2a2   : > { %947 = vsyncadd (!%p860_p2), %s714_s13, 4294967280  ;;  %p15_p3 = scmp.ge.s32.totalorder %s1018_s22, 4   ;;  %s1184_s17 = smov %s954_s18 }
 0x2a3   : > { %s1185_s18 = smov %s958_s19  ;;  %s1186_s19 = smov %s1028_s25 }
 0x2a4   : > { %s1187_s20 = smov %s1018_s22  ;;  %17 = sbr.rel (!%p15_p3) target bundleno = 5 (0x5), region = 74 }
 0x2ab   :  { %718 = vsyncpa [#allocation4], 1 }
 0x2ac   :  { %720 = vsyncpa [#allocation4 + $0x1], 1 }

</bundles_post_ra>
